<compile_context>
chip_gen: v7x
topology: tpu7x:2x2x1
jax: 0.10.0
libtpu: 0.0.40
codegen_flags: <defaults>
</compile_context>

<pallas_src>
import functools

import jax
import jax.numpy as jnp
from jax import lax
from jax.experimental import pallas as pl
from jax.experimental.pallas import tpu as pltpu


def _round_up(x, m):
    return ((x + m - 1) // m) * m


def _pick_batch_block(batch, t_pad, target_rows=1024):
    """Choose the per-grid-step batch block TB.

    On 1-TC chips (v5e/v6e) the grid is a serial loop, so prefer a SINGLE grid
    step whenever the merged M dim (TB*T_pad rows) fits the row budget.  When
    several steps are needed, make the step count even so a 2-TC chip (v7x)
    shards the 'parallel' batch axis evenly.  Returns (TB, nb, padded_batch).
    """
    if batch * t_pad <= target_rows:
        return batch, 1, batch
    tb = max(1, target_rows // t_pad)
    nb = -(-batch // tb)                      # cdiv
    if nb >= 2 and nb % 2:                    # even step count for v7x
        nb += 1
    return tb, nb, nb * tb


def _wordcnn_kernel(ks_max,
                    tok_ref,      # (1, TB, T_pad) int32
                    table_ref,    # (V, E)             compute dtype
                    wf_ref,       # (ks_max*E, CKpad)  compute dtype
                    bf_ref,       # (1, CKpad)         f32
                    wfc_ref,      # (CKpad, Cpad)      f32
                    bfc_ref,      # (1, Cpad)          f32
                    mask_ref,     # (T_pad, CKpad)     f32 validity mask
                    out_ref):     # (1, TB, Cpad)      f32
    _, tb, t_pad = tok_ref.shape
    v, _ = table_ref.shape
    ckpad = bf_ref.shape[1]
    n = tb * t_pad                        # merged batch*time rows (T_pad % 8 == 0)
    cdt = table_ref.dtype

    # ---- embedding lookup in-kernel: one-hot(ids) @ table on the MXU ----
    # One-hot is built directly in the compute dtype (no f32 intermediate).
    # TODO(synk): for production vocabularies replace the one-hot matmul with a
    # DMA/gather lookup (table in HBM via memory_space=pl.ANY + prefetched ids).
    ids = tok_ref[0]                                                   # (TB, T_pad)
    onehot = (lax.broadcasted_iota(jnp.int32, (tb, t_pad, v), 2)
              == ids[:, :, None]).astype(cdt).reshape(n, v)            # (N, V)
    emb = jnp.dot(onehot, table_ref[...],
                  preferred_element_type=jnp.float32)                  # (N, E) f32

    # ---- im2col along lanes: column block j = rows shifted by j taps. ----
    # XLU sublane rotates done on the f32 emb (no bf16 pack/unpack for odd
    # shifts); single cast to the compute dtype afterwards.  Wrapped rows only
    # land on time positions that are zeroed by the validity mask below.
    cols = [emb]
    for j in range(1, ks_max):
        cols.append(pltpu.roll(emb, shift=n - j, axis=0))
    xcol = jnp.concatenate(cols, axis=1).astype(cdt)                   # (N, ks_max*E)

    # ---- all three convs as ONE matmul, + bias, ReLU (f32) ----
    acc = jnp.dot(xcol, wf_ref[...], preferred_element_type=jnp.float32)
    acc = jnp.maximum(acc + bf_ref[...], 0.0)                          # (N, CKpad)

    # ---- precomputed validity mask, then max over time ----
    # post-ReLU values are >= 0, so masked (zeroed) rows never win the max.
    acc = acc.reshape(tb, t_pad, ckpad) * mask_ref[...]
    feat = jnp.max(acc, axis=1)                                        # (TB, CKpad)

    # ---- FC (weights kept f32 -- tiny); lane-dense Cpad output ----
    # TODO(synk): dropout is identity in eval mode; training-mode dropout not implemented.
    logits = jnp.dot(feat, wfc_ref[...],
                     preferred_element_type=jnp.float32) + bfc_ref[...]
    out_ref[0] = logits


def wordcnn_forward(tokens, params, kernel_sizes, *,
                    compute_dtype=jnp.float32, batch_block=None,
                    vmem_limit_bytes=64 * 1024 * 1024):
    """tokens: (B, T) int32. Returns logits (B, C) float32.

    compute_dtype=jnp.bfloat16 halves matmul-operand VMEM/DMA traffic and uses
    the bf16-native MXU path on v5e/v6e/v7x; accumulation and all post-matmul
    elementwise math stay in f32.
    """
    B, T = tokens.shape
    ks = tuple(int(k) for k in kernel_sizes)
    ks_max = max(ks)
    assert T >= ks_max, "sequence shorter than the largest kernel"

    table = params["embedding"].astype(compute_dtype)                  # (V, E)
    V, E = table.shape
    K = params["b1"].shape[-1]
    C = params["bfc"].shape[-1]
    CK = len(ks) * K
    CKpad = _round_up(CK, 128)          # lane-dense conv channels
    Cpad = _round_up(C, 128)            # lane-dense FC output

    # Fused conv weight: taps zero-padded to ks_max, channels concatenated and
    # zero-padded to CKpad, flattened to (ks_max*E, CKpad) for the im2col input.
    wf = jnp.zeros((ks_max, E, CKpad), jnp.float32)
    bf = jnp.zeros((1, CKpad), jnp.float32)
    for i, (w, b, k_i) in enumerate(((params["w1"], params["b1"], ks[0]),
                                     (params["w2"], params["b2"], ks[1]),
                                     (params["w3"], params["b3"], ks[2]))):
        wf = wf.at[:k_i, :, i * K:(i + 1) * K].set(w.astype(jnp.float32))
        bf = bf.at[:, i * K:(i + 1) * K].set(b.astype(jnp.float32))
    wf = wf.reshape(ks_max * E, CKpad).astype(compute_dtype)

    # FC weight/bias (kept f32 -- tiny), rows padded to CKpad, cols to Cpad.
    wfc = jnp.zeros((CKpad, Cpad), jnp.float32).at[:CK, :C].set(
        params["wfc"].astype(jnp.float32))
    bfc = jnp.zeros((1, Cpad), jnp.float32).at[:, :C].set(
        params["bfc"].astype(jnp.float32))

    # Pad T to a multiple of 8 so the in-kernel (TB,T,*) <-> (TB*T,*) merges are
    # layout-free; padded / out-of-window rows are zeroed by the mask below.
    T_pad = _round_up(T, 8)

    # Precomputed (T_pad, CKpad) validity mask: 1 on valid conv-window rows of
    # each conv's channel block, 0 elsewhere (incl. padded channel columns).
    mask = jnp.zeros((T_pad, CKpad), jnp.float32)
    for i, k_i in enumerate(ks):
        mask = mask.at[:T - k_i + 1, i * K:(i + 1) * K].set(1.0)

    tok = tokens.astype(jnp.int32)
    if T_pad != T:
        tok = jnp.pad(tok, ((0, 0), (0, T_pad - T)))

    # Batch blocking: single step when possible; pad the batch (don't shrink TB
    # to an awkward divisor) when several steps are needed.
    if batch_block is not None:
        TB = int(batch_block)
        nb = -(-B // TB)
        B_pad = nb * TB
    else:
        TB, nb, B_pad = _pick_batch_block(B, T_pad)
    if B_pad != B:
        tok = jnp.pad(tok, ((0, B_pad - B), (0, 0)))
    tok = tok.reshape(nb, TB, T_pad)

    kernel = functools.partial(_wordcnn_kernel, ks_max)

    def _const_spec(arr):
        # Grid-invariant input: constant index_map + single-buffered.
        nd = arr.ndim
        return pl.BlockSpec(arr.shape, lambda g, _nd=nd: (0,) * _nd,
                            pipeline_mode=pl.Buffered(1))

    # Advisory cost estimate for the XLA scheduler.
    N_tot = B_pad * T_pad
    isz = jnp.dtype(compute_dtype).itemsize
    flops = 2 * N_tot * (V * E + ks_max * E * CKpad) + 2 * B_pad * CKpad * Cpad
    bytes_accessed = (tok.size * 4 + table.size * isz + wf.size * isz
                      + bf.size * 4 + wfc.size * 4 + bfc.size * 4
                      + mask.size * 4 + B_pad * Cpad * 4)

    out = pl.pallas_call(
        kernel,
        out_shape=jax.ShapeDtypeStruct((nb, TB, Cpad), jnp.float32),
        grid_spec=pltpu.PrefetchScalarGridSpec(
            num_scalar_prefetch=0,
            grid=(nb,),
            in_specs=[
                pl.BlockSpec((1, TB, T_pad), lambda g: (g, 0, 0)),   # token ids
                _const_spec(table),
                _const_spec(wf), _const_spec(bf),
                _const_spec(wfc), _const_spec(bfc),
                _const_spec(mask),
            ],
            out_specs=pl.BlockSpec((1, TB, Cpad), lambda g: (g, 0, 0)),
        ),
        compiler_params=pltpu.CompilerParams(
            dimension_semantics=("parallel",),
            vmem_limit_bytes=int(vmem_limit_bytes)),
        cost_estimate=pl.CostEstimate(flops=int(flops), transcendentals=0,
                                      bytes_accessed=int(bytes_accessed)),
    )(tok, table, wf, bf, wfc, bfc, mask)

    return out.reshape(B_pad, Cpad)[:B, :C]


def wordcnn_reference(tokens, params, kernel_sizes):
    """Pure-JAX reference matching the PyTorch forward (eval mode)."""
    emb = jnp.take(params["embedding"], tokens, axis=0).astype(jnp.float32)  # (B, T, E)
    T = emb.shape[1]
    feats = []
    for w, b, ks in ((params["w1"], params["b1"], kernel_sizes[0]),
                     (params["w2"], params["b2"], kernel_sizes[1]),
                     (params["w3"], params["b3"], kernel_sizes[2])):
        t_out = T - ks + 1
        acc = sum(jnp.einsum("bte,ek->btk", emb[:, j:j + t_out, :], w[j])
                  for j in range(ks)) + b                 # (B, T_out, K)
        acc = jnp.maximum(acc, 0.0)
        feats.append(jnp.max(acc, axis=1))                # (B, K)
    feat = jnp.concatenate(feats, axis=1)                 # (B, 3K)
    return feat @ params["wfc"] + params["bfc"]


def init_params(key, vocab_size, embed_dim, kernel_num, kernel_sizes, class_num):
    ks = jax.random.split(key, 9)
    scale = 0.1
    return {
        "embedding": scale * jax.random.normal(ks[0], (vocab_size, embed_dim), jnp.float32),
        # conv weights stored as (ks, E, K)  (PyTorch Conv2d weight is (K, 1, ks, E))
        "w1": scale * jax.random.normal(ks[1], (kernel_sizes[0], embed_dim, kernel_num), jnp.float32),
        "b1": scale * jax.random.normal(ks[2], (1, kernel_num), jnp.float32),
        "w2": scale * jax.random.normal(ks[3], (kernel_sizes[1], embed_dim, kernel_num), jnp.float32),
        "b2": scale * jax.random.normal(ks[4], (1, kernel_num), jnp.float32),
        "w3": scale * jax.random.normal(ks[5], (kernel_sizes[2], embed_dim, kernel_num), jnp.float32),
        "b3": scale * jax.random.normal(ks[6], (1, kernel_num), jnp.float32),
        # fc weight stored as (3K, C)  (PyTorch Linear weight is (C, 3K))
        "wfc": scale * jax.random.normal(ks[7], (len(kernel_sizes) * kernel_num, class_num), jnp.float32),
        "bfc": scale * jax.random.normal(ks[8], (1, class_num), jnp.float32),
    }


if __name__ == "__main__":
    # Small config consistent with the module's __init__/forward.
    vocab_size = 50
    embed_dim = 32            # args.embed_dim
    kernel_num = 8            # args.kernel_num
    kernel_sizes = (3, 4, 5)  # args.kernel_sizes = "3,4,5"
    class_num = 4             # args.class_num
    batch, seq = 2, 16

    key = jax.random.PRNGKey(0)
    pkey, tkey = jax.random.split(key)
    params = init_params(pkey, vocab_size, embed_dim, kernel_num, kernel_sizes, class_num)
    tokens = jax.random.randint(tkey, (batch, seq), 0, vocab_size, dtype=jnp.int32)

    ref = wordcnn_reference(tokens, params, kernel_sizes)

    # f32 operand path
    logits = jax.block_until_ready(wordcnn_forward(tokens, params, kernel_sizes))
    assert logits.shape == (batch, class_num)
    assert jnp.allclose(logits, ref, atol=1e-3, rtol=1e-3), "f32 kernel mismatch vs reference"

    # bf16 operand path (f32 accumulation; valid on v5e/v6e/v7x)
    logits_bf16 = jax.block_until_ready(
        wordcnn_forward(tokens, params, kernel_sizes, compute_dtype=jnp.bfloat16))
    assert jnp.allclose(logits_bf16, ref, atol=5e-2, rtol=5e-2), "bf16 kernel mismatch vs reference"

    print("KERNEL_OK")
</pallas_src>

<mosaic_0001>
module attributes {stable_mosaic.version = 11 : i64} {
  func.func @_wordcnn_kernel(%arg0: i32, %arg1: memref<1x2x16xi32, #tpu.memory_space<vmem>>, %arg2: memref<50x32xf32, #tpu.memory_space<vmem>>, %arg3: memref<160x128xf32, #tpu.memory_space<vmem>>, %arg4: memref<1x128xf32, #tpu.memory_space<vmem>>, %arg5: memref<128x128xf32, #tpu.memory_space<vmem>>, %arg6: memref<1x128xf32, #tpu.memory_space<vmem>>, %arg7: memref<16x128xf32, #tpu.memory_space<vmem>>, %arg8: memref<1x2x128xf32, #tpu.memory_space<vmem>>) attributes {dimension_semantics = [#tpu.dimension_semantics<parallel>], iteration_bounds = array<i64: 1>, scalar_prefetch = 0 : i64, scratch_operands = 0 : i64, tpu.core_type = #tpu.core_type<tc>, window_params = [{transform_indices = @transform_0, window_bounds = array<i64: 1, 2, 16>}, {pipeline_mode = #tpu.pipeline_mode<synchronous>, transform_indices = @transform_1, window_bounds = array<i64: 50, 32>}, {pipeline_mode = #tpu.pipeline_mode<synchronous>, transform_indices = @transform_2, window_bounds = array<i64: 160, 128>}, {pipeline_mode = #tpu.pipeline_mode<synchronous>, transform_indices = @transform_3, window_bounds = array<i64: 1, 128>}, {pipeline_mode = #tpu.pipeline_mode<synchronous>, transform_indices = @transform_4, window_bounds = array<i64: 128, 128>}, {pipeline_mode = #tpu.pipeline_mode<synchronous>, transform_indices = @transform_5, window_bounds = array<i64: 1, 128>}, {pipeline_mode = #tpu.pipeline_mode<synchronous>, transform_indices = @transform_6, window_bounds = array<i64: 16, 128>}, {transform_indices = @transform_7, window_bounds = array<i64: 1, 2, 128>}]} {
    %c0 = arith.constant 0 : index
    %c0_0 = arith.constant 0 : index
    %c0_1 = arith.constant 0 : index
    %0 = vector.load %arg1[%c0, %c0_0, %c0_1] : memref<1x2x16xi32, #tpu.memory_space<vmem>>, vector<1x2x16xi32>
    %1 = vector.shape_cast %0 : vector<1x2x16xi32> to vector<2x16xi32>
    %2 = tpu.iota {dimensions = array<i32: 2>} : vector<2x16x50xi32>
    %3 = vector.shape_cast %1 : vector<2x16xi32> to vector<2x16x1xi32>
    %4 = vector.broadcast %3 : vector<2x16x1xi32> to vector<2x16x50xi32>
    %5 = arith.cmpi eq, %2, %4 : vector<2x16x50xi32>
    %6 = arith.extui %5 : vector<2x16x50xi1> to vector<2x16x50xi32>
    %7 = arith.sitofp %6 : vector<2x16x50xi32> to vector<2x16x50xf32>
    %8 = vector.shape_cast %7 : vector<2x16x50xf32> to vector<32x50xf32>
    %c0_2 = arith.constant 0 : index
    %c0_3 = arith.constant 0 : index
    %9 = vector.load %arg2[%c0_2, %c0_3] : memref<50x32xf32, #tpu.memory_space<vmem>>, vector<50x32xf32>
    %cst = arith.constant dense<0.000000e+00> : vector<32x32xf32>
    %10 = tpu.matmul %8, %9, %cst {dimension_numbers = #tpu.dot_dimension_numbers<[1], [0], [0], [1], [0, 0, 1, 1], [], []>} : vector<32x50xf32>, vector<50x32xf32>, vector<32x32xf32> -> vector<32x32xf32>
    %c31_i32 = arith.constant 31 : i32
    %11 = tpu.dynamic_rotate %10 by %c31_i32 dim 0 : vector<32x32xf32>, i32 -> vector<32x32xf32>
    %c30_i32 = arith.constant 30 : i32
    %12 = tpu.dynamic_rotate %10 by %c30_i32 dim 0 : vector<32x32xf32>, i32 -> vector<32x32xf32>
    %c29_i32 = arith.constant 29 : i32
    %13 = tpu.dynamic_rotate %10 by %c29_i32 dim 0 : vector<32x32xf32>, i32 -> vector<32x32xf32>
    %c28_i32 = arith.constant 28 : i32
    %14 = tpu.dynamic_rotate %10 by %c28_i32 dim 0 : vector<32x32xf32>, i32 -> vector<32x32xf32>
    %15 = tpu.concatenate %10, %11, %12, %13, %14 in 1 : vector<32x32xf32>, vector<32x32xf32>, vector<32x32xf32>, vector<32x32xf32>, vector<32x32xf32> -> vector<32x160xf32>
    %c0_4 = arith.constant 0 : index
    %c0_5 = arith.constant 0 : index
    %16 = vector.load %arg3[%c0_4, %c0_5] : memref<160x128xf32, #tpu.memory_space<vmem>>, vector<160x128xf32>
    %cst_6 = arith.constant dense<0.000000e+00> : vector<32x128xf32>
    %17 = tpu.matmul %15, %16, %cst_6 {dimension_numbers = #tpu.dot_dimension_numbers<[1], [0], [0], [1], [0, 0, 1, 1], [], []>} : vector<32x160xf32>, vector<160x128xf32>, vector<32x128xf32> -> vector<32x128xf32>
    %c0_7 = arith.constant 0 : index
    %c0_8 = arith.constant 0 : index
    %18 = vector.load %arg4[%c0_7, %c0_8] : memref<1x128xf32, #tpu.memory_space<vmem>>, vector<1x128xf32>
    %19 = vector.broadcast %18 : vector<1x128xf32> to vector<32x128xf32>
    %20 = arith.addf %17, %19 : vector<32x128xf32>
    %cst_9 = arith.constant 0.000000e+00 : f32
    %21 = vector.broadcast %cst_9 : f32 to vector<32x128xf32>
    %22 = arith.maximumf %20, %21 : vector<32x128xf32>
    %23 = vector.shape_cast %22 : vector<32x128xf32> to vector<2x16x128xf32>
    %c0_10 = arith.constant 0 : index
    %c0_11 = arith.constant 0 : index
    %24 = vector.load %arg7[%c0_10, %c0_11] : memref<16x128xf32, #tpu.memory_space<vmem>>, vector<16x128xf32>
    %25 = vector.shape_cast %24 : vector<16x128xf32> to vector<1x16x128xf32>
    %26 = vector.broadcast %25 : vector<1x16x128xf32> to vector<2x16x128xf32>
    %27 = arith.mulf %23, %26 : vector<2x16x128xf32>
    %cst_12 = arith.constant dense<0xFF800000> : vector<2x128xf32>
    %28 = vector.multi_reduction <maximumf>, %27, %cst_12 [1] : vector<2x16x128xf32> to vector<2x128xf32>
    %c0_13 = arith.constant 0 : index
    %c0_14 = arith.constant 0 : index
    %29 = vector.load %arg5[%c0_13, %c0_14] : memref<128x128xf32, #tpu.memory_space<vmem>>, vector<128x128xf32>
    %cst_15 = arith.constant dense<0.000000e+00> : vector<2x128xf32>
    %30 = tpu.matmul %28, %29, %cst_15 {dimension_numbers = #tpu.dot_dimension_numbers<[1], [0], [0], [1], [0, 0, 1, 1], [], []>} : vector<2x128xf32>, vector<128x128xf32>, vector<2x128xf32> -> vector<2x128xf32>
    %c0_16 = arith.constant 0 : index
    %c0_17 = arith.constant 0 : index
    %31 = vector.load %arg6[%c0_16, %c0_17] : memref<1x128xf32, #tpu.memory_space<vmem>>, vector<1x128xf32>
    %32 = vector.broadcast %31 : vector<1x128xf32> to vector<2x128xf32>
    %33 = arith.addf %30, %32 : vector<2x128xf32>
    %c0_18 = arith.constant 0 : index
    %c0_19 = arith.constant 0 : index
    %c0_20 = arith.constant 0 : index
    %34 = vector.load %arg8[%c0_18, %c0_19, %c0_20] : memref<1x2x128xf32, #tpu.memory_space<vmem>>, vector<1x2x128xf32>
    %35 = vector.shape_cast %34 : vector<1x2x128xf32> to vector<2x128xf32>
    %36 = vector.shape_cast %33 : vector<2x128xf32> to vector<1x2x128xf32>
    tpu.vector_store %arg8[%c0_18, %c0_19, %c0_20], %36 {strides = array<i32>} : memref<1x2x128xf32, #tpu.memory_space<vmem>>, vector<1x2x128xf32>,
    return
  }
  func.func @transform_0(%arg0: i32) -> (i32, i32, i32) {
    %c0_i32 = arith.constant 0 : i32
    %c0_i32_0 = arith.constant 0 : i32
    %c0_i32_1 = arith.constant 0 : i32
    return %arg0, %c0_i32, %c0_i32_0 : i32, i32, i32
  }
  func.func @transform_1(%arg0: i32) -> (i32, i32) {
    %c0_i32 = arith.constant 0 : i32
    %c0_i32_0 = arith.constant 0 : i32
    %c0_i32_1 = arith.constant 0 : i32
    return %c0_i32, %c0_i32_0 : i32, i32
  }
  func.func @transform_2(%arg0: i32) -> (i32, i32) {
    %c0_i32 = arith.constant 0 : i32
    %c0_i32_0 = arith.constant 0 : i32
    %c0_i32_1 = arith.constant 0 : i32
    return %c0_i32, %c0_i32_0 : i32, i32
  }
  func.func @transform_3(%arg0: i32) -> (i32, i32) {
    %c0_i32 = arith.constant 0 : i32
    %c0_i32_0 = arith.constant 0 : i32
    %c0_i32_1 = arith.constant 0 : i32
    return %c0_i32, %c0_i32_0 : i32, i32
  }
  func.func @transform_4(%arg0: i32) -> (i32, i32) {
    %c0_i32 = arith.constant 0 : i32
    %c0_i32_0 = arith.constant 0 : i32
    %c0_i32_1 = arith.constant 0 : i32
    return %c0_i32, %c0_i32_0 : i32, i32
  }
  func.func @transform_5(%arg0: i32) -> (i32, i32) {
    %c0_i32 = arith.constant 0 : i32
    %c0_i32_0 = arith.constant 0 : i32
    %c0_i32_1 = arith.constant 0 : i32
    return %c0_i32, %c0_i32_0 : i32, i32
  }
  func.func @transform_6(%arg0: i32) -> (i32, i32) {
    %c0_i32 = arith.constant 0 : i32
    %c0_i32_0 = arith.constant 0 : i32
    %c0_i32_1 = arith.constant 0 : i32
    return %c0_i32, %c0_i32_0 : i32, i32
  }
  func.func @transform_7(%arg0: i32) -> (i32, i32, i32) {
    %c0_i32 = arith.constant 0 : i32
    %c0_i32_0 = arith.constant 0 : i32
    %c0_i32_1 = arith.constant 0 : i32
    return %arg0, %c0_i32, %c0_i32_0 : i32, i32, i32
  }
}

</mosaic_0001>

<bundles_post_ra>
// kernel: tpu_custom_call.1
= control target key start
LH: loop header
LB: loop body
LE: loop exit
PB: predicated region body
PF: predicated region fallthrough
CT: control target
= control target key end

     0   :  { %12 = vsyncpa [#allocation3], 0  ;;  %s1270_s0 = inlined_call_operand.hbm [shape: s32[1,2,16], index: 0, kind: input, shape index: {}]   ;;  %s1271_s1 = inlined_call_operand.hbm [shape: f32[50,32], index: 1, kind: input, shape index: {}]   ;;  %s1272_s2 = inlined_call_operand.hbm [shape: f32[160,128], index: 2, kind: input, shape index: {}]   ;;  %s1273_s3 = inlined_call_operand.hbm [shape: f32[1,128], index: 3, kind: input, shape index: {}]   ;;  %s1274_s4 = inlined_call_operand.hbm [shape: f32[128,128], index: 4, kind: input, shape index: {}]   ;;  %s1275_s5 = inlined_call_operand.hbm [shape: f32[1,128], index: 5, kind: input, shape index: {}]   ;;  %s1276_s6 = inlined_call_operand.hbm [shape: f32[16,128], index: 6, kind: input, shape index: {}]   ;;  %s1277_s7 = inlined_call_operand.hbm [shape: f32[1,2,128], index: 7, kind: output, shape index: {}]  }
   0x1   :  { %13 = vsyncpa [#allocation6], 0 }
   0x2   :  { %14 = vsyncpa [#allocation9], 0 }
   0x3   :  { %15 = vsyncpa [#allocation12], 0 }
   0x4   :  { %16 = vsyncpa [#allocation4], 0  ;;  %s1009_s24 = smov [#allocation5]   ;;  %s823_s28 = scalar_lea.hbm %s1271_s1, 896 }
   0x5   :  { %s32_s25 = sshll.u32 %s1009_s24, 4  ;;  %p824_p0 = scmp.ne.s32.totalorder %s1271_s1, %s823_s28  ;;  %s33_s25 = int_to_ptr.vmem [resolvable:$true] %s32_s25 }
   0x6   :  { %p827_p1 = scmp.lt.u32.totalorder %s823_s28, %s1271_s1 }
   0x8   :  { %p829_p2 = pnand %p827_p1, %p824_p0 }
   0xa   :  { %832 = shalt.err (!%p829_p2)
}
   0xb   :  { %s833_s10 = scalar_lea.vmem %s33_s25, 896  ;;  %p838_p4 = scmp.lt.s32.totalorder %s33_s25, %s33_s25 }
   0xc   :  { %p834_p3 = scmp.ne.s32.totalorder %s33_s25, %s833_s10  ;;  %p839_p5 = scmp.lt.s32.totalorder %s833_s10, %s833_s10 }
   0xe   :  { %p840_p6 = por %p839_p5, %p838_p4 }
  0x10   :  { %p841_p7 = pnand %p840_p6, %p834_p3 }
  0x12   :  { %844 = shalt.err (!%p841_p7)
}
  0x13   :  { %s1010_s11 = smov 128   ;;  %s1011_s12 = smov 8  }
  0x14   :  { %38 = dma.hbm_to_vmem [thread:$0]  %s1271_s1, 896, %s33_s25, [#allocation6], %s1010_s11, %s1010_s11, %s1011_s12  }
  0x15   :  { %s1012_s15 = smov [#allocation8]   ;;  %s1013_s17 = smov [#allocation11]  }
  0x16   :  { %s57_s16 = sshll.u32 %s1012_s15, 4  ;;  %s79_s18 = sshll.u32 %s1013_s17, 4  ;;  %s58_s16 = int_to_ptr.vmem [resolvable:$true] %s57_s16  ;;  %s80_s18 = int_to_ptr.vmem [resolvable:$true] %s79_s18 }
  0x17   :  { %s845_s21 = scalar_lea.hbm %s1273_s3, 16 }
  0x18   :  { %p846_p8 = scmp.ne.s32.totalorder %s1273_s3, %s845_s21  ;;  %p849_p9 = scmp.lt.u32.totalorder %s845_s21, %s1273_s3 }
  0x1a   :  { %p851_p10 = pnand %p849_p9, %p846_p8 }
  0x1c   :  { %854 = shalt.err (!%p851_p10)
}
  0x1d   :  { %s855_s1 = scalar_lea.vmem %s58_s16, 16  ;;  %s859_s25 = scalar_lea.vmem %s58_s16, 32 }
  0x1e   :  { %p856_p11 = scmp.ne.s32.totalorder %s58_s16, %s855_s1  ;;  %p860_p12 = scmp.lt.s32.totalorder %s58_s16, %s58_s16 }
  0x1f   :  { %p861_p13 = scmp.lt.s32.totalorder %s859_s25, %s855_s1 }
  0x21   :  { %p862_p0 = por %p861_p13, %p860_p12 }
  0x23   :  { %p863_p1 = pnand %p862_p0, %p856_p11 }
  0x25   :  { %866 = shalt.err (!%p863_p1)
}
  0x26   :  { %60 = dma.hbm_to_vmem [thread:$0]  %s1273_s3, 16, %s58_s16, [#allocation9]  }
  0x27   :  { %s867_s8 = scalar_lea.hbm %s1275_s5, 16 }
  0x28   :  { %p868_p2 = scmp.ne.s32.totalorder %s1275_s5, %s867_s8  ;;  %p871_p3 = scmp.lt.u32.totalorder %s867_s8, %s1275_s5 }
  0x2a   :  { %p873_p4 = pnand %p871_p3, %p868_p2 }
  0x2c   :  { %876 = shalt.err (!%p873_p4)
}
  0x2d   :  { %s877_s15 = scalar_lea.vmem %s80_s18, 16  ;;  %s881_s17 = scalar_lea.vmem %s80_s18, 32 }
  0x2e   :  { %p878_p5 = scmp.ne.s32.totalorder %s80_s18, %s877_s15  ;;  %p882_p6 = scmp.lt.s32.totalorder %s80_s18, %s80_s18 }
  0x2f   :  { %p883_p7 = scmp.lt.s32.totalorder %s881_s17, %s877_s15 }
  0x31   :  { %p884_p8 = por %p883_p7, %p882_p6 }
  0x33   :  { %p885_p9 = pnand %p884_p8, %p878_p5 }
  0x35   :  { %888 = shalt.err (!%p885_p9)
}
  0x36   :  { %82 = dma.hbm_to_vmem [thread:$0]  %s1275_s5, 16, %s80_s18, [#allocation12]  }
  0x37   :  { %s1014_s19 = smov [#allocation2]   ;;  %s1015_s21 = smov [#allocation7]  }
  0x38   :  { %s23_s20 = sshll.u32 %s1014_s19, 4  ;;  %s44_s22 = sshll.u32 %s1015_s21, 4  ;;  %s24_s20 = int_to_ptr.vmem [resolvable:$true] %s23_s20  ;;  %s45_s22 = int_to_ptr.vmem [resolvable:$true] %s44_s22 }
  0x39   :  { %s889_s26 = scalar_lea.hbm %s1270_s0, 32 }
  0x3a   :  { %p890_p10 = scmp.ne.s32.totalorder %s1270_s0, %s889_s26  ;;  %p893_p11 = scmp.lt.u32.totalorder %s889_s26, %s1270_s0 }
  0x3c   :  { %p895_p12 = pnand %p893_p11, %p890_p10 }
  0x3e   :  { %898 = shalt.err (!%p895_p12)
}
  0x3f   :  { %s899_s5 = scalar_lea.vmem %s24_s20, 32  ;;  %p904_p0 = scmp.lt.s32.totalorder %s24_s20, %s24_s20 }
  0x40   :  { %p900_p13 = scmp.ne.s32.totalorder %s24_s20, %s899_s5  ;;  %p905_p1 = scmp.lt.s32.totalorder %s899_s5, %s899_s5 }
  0x42   :  { %p906_p2 = por %p905_p1, %p904_p0 }
  0x44   :  { %p907_p3 = pnand %p906_p2, %p900_p13 }
  0x46   :  { %910 = shalt.err (!%p907_p3)
}
  0x47   :  { %26 = dma.hbm_to_vmem [thread:$0]  %s1270_s0, 32, %s24_s20, [#allocation3]  }
  0x48   :  { %s911_s9 = scalar_lea.hbm %s1272_s2, 2560 }
  0x49   :  { %p912_p4 = scmp.ne.s32.totalorder %s1272_s2, %s911_s9  ;;  %p915_p5 = scmp.lt.u32.totalorder %s911_s9, %s1272_s2 }
  0x4b   :  { %p917_p6 = pnand %p915_p5, %p912_p4 }
  0x4d   :  { %920 = shalt.err (!%p917_p6)
}
  0x4e   :  { %s921_s17 = scalar_lea.vmem %s45_s22, 2560  ;;  %p926_p8 = scmp.lt.s32.totalorder %s45_s22, %s45_s22 }
  0x4f   :  { %p922_p7 = scmp.ne.s32.totalorder %s45_s22, %s921_s17  ;;  %p927_p9 = scmp.lt.s32.totalorder %s921_s17, %s921_s17 }
  0x51   :  { %p928_p10 = por %p927_p9, %p926_p8 }
  0x53   :  { %p929_p11 = pnand %p928_p10, %p922_p7 }
  0x55   :  { %932 = shalt.err (!%p929_p11)
}
  0x56   :  { %50 = dma.hbm_to_vmem [thread:$0]  %s1272_s2, 2560, %s45_s22, [#allocation6], %s1010_s11, %s1010_s11, %s1011_s12  }
  0x57   :  { %s1016_s16 = smov [#allocation10]   ;;  %s1017_s20 = smov [#allocation13]  }
  0x58   :  { %s66_s19 = sshll.u32 %s1016_s16, 4  ;;  %s88_s21 = sshll.u32 %s1017_s20, 4  ;;  %s67_s19 = int_to_ptr.vmem [resolvable:$true] %s66_s19  ;;  %s89_s21 = int_to_ptr.vmem [resolvable:$true] %s88_s21 }
  0x59   :  { %s933_s26 = scalar_lea.hbm %s1274_s4, 2048 }
  0x5a   :  { %p934_p12 = scmp.ne.s32.totalorder %s1274_s4, %s933_s26  ;;  %p937_p13 = scmp.lt.u32.totalorder %s933_s26, %s1274_s4 }
  0x5c   :  { %p939_p0 = pnand %p937_p13, %p934_p12 }
  0x5e   :  { %942 = shalt.err (!%p939_p0)
}
  0x5f   :  { %s943_s2 = scalar_lea.vmem %s67_s19, 2048  ;;  %p948_p2 = scmp.lt.s32.totalorder %s67_s19, %s67_s19 }
  0x60   :  { %p944_p1 = scmp.ne.s32.totalorder %s67_s19, %s943_s2  ;;  %p949_p3 = scmp.lt.s32.totalorder %s943_s2, %s943_s2 }
  0x62   :  { %p950_p4 = por %p949_p3, %p948_p2 }
  0x64   :  { %p951_p5 = pnand %p950_p4, %p944_p1 }
  0x66   :  { %954 = shalt.err (!%p951_p5)
}
  0x67   :  { %72 = dma.hbm_to_vmem [thread:$0]  %s1274_s4, 2048, %s67_s19, [#allocation9], %s1010_s11, %s1010_s11, %s1011_s12  }
  0x68   :  { %s955_s30 = scalar_lea.hbm %s1276_s6, 256 }
  0x69   :  { %p956_p6 = scmp.ne.s32.totalorder %s1276_s6, %s955_s30  ;;  %p959_p7 = scmp.lt.u32.totalorder %s955_s30, %s1276_s6 }
  0x6b   :  { %p961_p8 = pnand %p959_p7, %p956_p6 }
  0x6d   :  { %964 = shalt.err (!%p961_p8)
}
  0x6e   :  { %s965_s14 = scalar_lea.vmem %s89_s21, 256  ;;  %p970_p10 = scmp.lt.s32.totalorder %s89_s21, %s89_s21 }
  0x6f   :  { %p966_p9 = scmp.ne.s32.totalorder %s89_s21, %s965_s14  ;;  %p971_p11 = scmp.lt.s32.totalorder %s965_s14, %s965_s14 }
  0x71   :  { %p972_p12 = por %p971_p11, %p970_p10 }
  0x73   :  { %p973_p13 = pnand %p972_p12, %p966_p9 }
  0x75   :  { %976 = shalt.err (!%p973_p13)
}
  0x76   :  { %94 = dma.hbm_to_vmem [thread:$0]  %s1276_s6, 256, %s89_s21, [#allocation12], %s1010_s11, %s1010_s11, %s1011_s12  }
  0x77   :  { %999 = dma.done.wait [#allocation3], 32  }
  0x78   :  { %1000 = vsyncadd [#allocation3], 4294967264 }
  0x79   :  { %1001 = dma.done.wait [#allocation6], 3456  }
  0x7a   :  { %1002 = vsyncadd [#allocation6], 4294963840 }
  0x7b   :  { %1003 = dma.done.wait [#allocation9], 2064  }
  0x7c   :  { %1004 = vsyncadd [#allocation9], 4294965232 }
  0x7d   :  { %1005 = dma.done.wait [#allocation12], 272  }
  0x7e   :  { %1006 = vsyncadd [#allocation12], 4294967024  ;;  %v117_v0 = vlaneseq  ;;  %v116_v4 = vld [vmem:[#allocation2] sm:$0x3]  ;;  %v153_v5 = vld [vmem:[#allocation5] sm:$0xff]  ;;  %vm173_vm0 = vcmask 1041408  }
  0x7f   :  { %v154_v6 = vld [vmem:[#allocation5 + $0x8] sm:$0xff]  ;;  %v155_v10 = vld [vmem:[#allocation5 + $0x10] sm:$0xff]  ;;  %v156_v11 = vld [vmem:[#allocation5 + $0x18] sm:$0xff]  ;;  %vm160_vm1 = vcmask 408576   ;;  %v1018_v20 = vmov 0.0   ;;  %v1019_v30 = vmov 0.0|0.0  }
  0x80   :  { %v1161_v1 = vshrl.u32 %v117_v0, 7  ;;  %v726_v9 = vpack.c.bf16 %v154_v6, %v153_v5  ;;  %v730_v12 = vpack.c.bf16 %v156_v11, %v155_v10  ;;  %v157_v13 = vld [vmem:[#allocation5 + $0x20] sm:$0xff]  ;;  %v158_v14 = vld [vmem:[#allocation5 + $0x28] sm:$0xff]  ;;  %v159_v16 = vld [vmem:[#allocation5 + $0x30] sm:$0x3]  ;;  %v118_v17 = vand.u32 127, %v117_v0  ;;  %738 = vmatprep.subr.bf16.mxu1 %v1019_v30 }
  0x81   :  { %v734_v15 = vpack.c.bf16 %v158_v14, %v157_v13  ;;  %v363_v27 = vld [vmem:[#allocation7] sm:$0xff]  ;;  %v364_v28 = vld [vmem:[#allocation7 + $0x8] sm:$0xff]  ;;  %v365_v29 = vld [vmem:[#allocation7 + $0x10] sm:$0xff]  ;;  %vm348_vm7 = vcmask 261120   ;;  %s1020_s6 = smov 64   ;;  %s1021_s11 = smov 32  }
  0x82   :  { %v121_v2 = vsub.s32 0, %v1161_v1  ;;  %v132_v3 = vsub.s32 1, %v1161_v1  ;;  %727 = vmatprep.subr.bf16.mxu0 %v726_v9  ;;  %v739_v31 = vpack.c.bf16 %v364_v28, %v363_v27  ;;  %v366_v32 = vld [vmem:[#allocation7 + $0x18] sm:$0xff]  ;;  %v367_v34 = vld [vmem:[#allocation7 + $0x20] sm:$0xff]  ;;  %v368_v35 = vld [vmem:[#allocation7 + $0x28] sm:$0xff]  ;;  %vm295_vm6 = vcmp.lt.s32.totalorder %v1161_v1, 4 }
  0x83   :  { %729 = vmatpush3.bf16.msra.mxu0 %v726_v9  ;;  %v742_v33 = vpack.c.bf16 %v366_v32, %v365_v29  ;;  %v745_v36 = vpack.c.bf16 %v368_v35, %v367_v34  ;;  %v369_v37 = vld [vmem:[#allocation7 + $0x30] sm:$0xff]  ;;  %v370_v38 = vld [vmem:[#allocation7 + $0x38] sm:$0xff]  ;;  %v371_v40 = vld [vmem:[#allocation7 + $0x40] sm:$0xff]  ;;  %vm277_vm8 = vcmp.lt.s32.totalorder %v1161_v1, 6  ;;  %vm268_vm9 = vcmp.lt.s32.totalorder %v1161_v1, 7  ;;  %s1022_s12 = smov 96  }
  0x84   :  { %v122_v7 = vrot.slane %v116_v4, %v121_v2  ;;  %v133_v8 = vrot.slane %v116_v4, %v132_v3  ;;  %731 = vmatprep.subr.bf16.mxu0 %v730_v12  ;;  %740 = vmatpush1.bf16.msra.mxu1 %v739_v31  ;;  %v748_v39 = vpack.c.bf16 %v370_v38, %v369_v37  ;;  %v372_v41 = vld [vmem:[#allocation7 + $0x48] sm:$0xff]  ;;  %v373_v43 = vld [vmem:[#allocation7 + $0x50] sm:$0xff]  ;;  %v374_v44 = vld [vmem:[#allocation7 + $0x58] sm:$0xff]  ;;  %vm286_vm10 = vcmp.lt.s32.totalorder %v1161_v1, 5  ;;  %s1024_s17 = smov [#allocation14]  }
  0x85   :  { %741 = vmatprep.subr.bf16.mxu1 %v1019_v30  ;;  %v751_v42 = vpack.c.bf16 %v372_v41, %v371_v40  ;;  %v754_v45 = vpack.c.bf16 %v374_v44, %v373_v43  ;;  %v375_v46 = vld [vmem:[#allocation7 + $0x60] sm:$0xff]  ;;  %v376_v47 = vld [vmem:[#allocation7 + $0x68] sm:$0xff]  ;;  %v377_v49 = vld [vmem:[#allocation7 + $0x70] sm:$0xff]  ;;  %vm353_vm11 = vcmask 523264   ;;  %vm358_vm12 = vcmask 785408   ;;  %s616_s0 = sshll.u32 %s1024_s17, 4  ;;  %s617_s0 = int_to_ptr.vmem [resolvable:$true] %s616_s0 }
  0x86   :  { %124 = vbcast.lane.b32.xlu0 %v122_v7, 256  ;;  %135 = vbcast.lane.b32.xlu1 %v133_v8, 256  ;;  %v757_v48 = vpack.c.bf16 %v376_v47, %v375_v46  ;;  %v378_v50 = vld [vmem:[#allocation7 + $0x78] sm:$0xff]  ;;  %v379_v52 = vld [vmem:[#allocation7 + $0x80] sm:$0xff]  ;;  %v380_v53 = vld [vmem:[#allocation7 + $0x88] sm:$0xff]  ;;  %vm1023_vm13 = vmmov 0   ;;  %p982_p1 = scmp.lt.s32.totalorder %s617_s0, %s617_s0 }
  0x87   :  { %733 = vmatpush3.bf16.msra.mxu0 %v730_v12  ;;  %v760_v51 = vpack.c.bf16 %v378_v50, %v377_v49  ;;  %v763_v54 = vpack.c.bf16 %v380_v53, %v379_v52  ;;  %v381_v61 = vld [vmem:[#allocation7 + $0x90] sm:$0xff]  ;;  %v382_v3 = vld [vmem:[#allocation7 + $0x98] sm:$0xff]  ;;  %vm536_vm14 = vcmask 1041409   ;;  %s977_s3 = scalar_lea.vmem %s617_s0, 32 }
  0x88   :  { %735 = vmatprep.subr.bf16.mxu0 %v734_v15  ;;  %743 = vmatpush1.bf16.msra.mxu1 %v742_v33  ;;  %v766_v4 = vpack.c.bf16 %v382_v3, %v381_v61  ;;  %v514_v3 = vld [vmem:[#allocation10 + $0x18] sm:$0xff]  ;;  %p978_p0 = scmp.ne.s32.totalorder %s617_s0, %s977_s3  ;;  %p983_p2 = scmp.lt.s32.totalorder %s977_s3, %s977_s3 }
  0x89   :  { %744 = vmatprep.subr.bf16.mxu1 %v1019_v30 }
  0x8a   :  { %128 = vbcast.lane.b32.xlu0 %v122_v7, 264  ;;  %139 = vbcast.lane.b32.xlu1 %v133_v8, 264  ;;  %p984_p3 = por %p983_p2, %p982_p1 }
  0x8b   :  { %737 = vmatpush3.bf16.msra.mxu0 %v734_v15 }
  0x8c   :  { %683 = vmatprep.subr.msk.mxu0 %vm173_vm0, %v159_v16  ;;  %746 = vmatpush1.bf16.msra.mxu1 %v745_v36  ;;  %p985_p4 = pnand %p984_p3, %p978_p0 }
  0x8d   :  { %747 = vmatprep.subr.bf16.mxu1 %v1019_v30 }
  0x8f   :  { %684 = vmatpush3.msk.msra.mxu0 %vm173_vm0, %v159_v16 }
  0x90   :  { %768 = vmatprep.subr.bf16.mxu0 %v1019_v30  ;;  %749 = vmatpush1.bf16.msra.mxu1 %v748_v39 }
  0x91   :  { %750 = vmatprep.subr.bf16.mxu1 %v1019_v30 }
  0x94   :  { %752 = vmatpush1.bf16.msra.mxu1 %v751_v42 }
  0x95   :  { %753 = vmatprep.subr.bf16.mxu1 %v1019_v30 }
  0x98   :  { %755 = vmatpush1.bf16.msra.mxu1 %v754_v45 }
  0x99   :  { %756 = vmatprep.subr.bf16.mxu1 %v1019_v30 }
  0x9c   :  { %758 = vmatpush1.bf16.msra.mxu1 %v757_v48 }
  0x9d   :  { %759 = vmatprep.subr.bf16.mxu1 %v1019_v30 }
  0xa0   :  { %761 = vmatpush1.bf16.msra.mxu1 %v760_v51 }
  0xa1   :  { %762 = vmatprep.subr.bf16.mxu1 %v1019_v30 }
  0xa4   :  { %764 = vmatpush1.bf16.msra.mxu1 %v763_v54 }
  0xa5   :  { %765 = vmatprep.subr.bf16.mxu1 %v1019_v30 }
  0xa8   :  { %767 = vmatpush1.bf16.msra.mxu1 %v766_v4 }
  0xf8   :  { %v125_v18 = vpop.permute.xlu0 %124  ;;  %v136_v19 = vpop.permute.xlu1 %135 }
  0xf9   :  { %vm141_vm2 = vcmp.eq.s32.totalorder %v118_v17, %v125_v18  ;;  %vm143_vm3 = vcmp.eq.s32.totalorder %v118_v17, %v136_v19 }
  0xfa   :  { %v628_v21 = vsel %vm141_vm2, 1.0, %v1018_v20  ;;  %v630_v24 = vsel %vm143_vm3, 1.0, %v1018_v20 }
  0xfb   :  { %685 = vmatprep.mubr.msk.f32.mxu0 %vm160_vm1, %v628_v21 }
  0xfc   :  { %v129_v22 = vpop.permute.xlu0 %128  ;;  %v140_v23 = vpop.permute.xlu1 %139 }
  0xfd   :  { %vm142_vm4 = vcmp.eq.s32.totalorder %v118_v17, %v129_v22  ;;  %vm144_vm5 = vcmp.eq.s32.totalorder %v118_v17, %v140_v23 }
  0xfe   :  { %v629_v25 = vsel %vm142_vm4, 1.0, %v1018_v20  ;;  %v631_v26 = vsel %vm144_vm5, 1.0, %v1018_v20 }
  0xff   :  { %686 = vmatmul.mubr.msk.f32.vlgmr.msra.gmra.mrb[0].mxu0 %vm160_vm1, %v629_v25 }
 0x100   :  { %688 = vmatprep.mubr.msk.f32.mxu0 %vm160_vm1, %v630_v24 }
 0x103   :  { %689 = vmatmul.mubr.msk.f32.gmra.mrb[2].mxu0 %vm160_vm1, %v631_v26 }
 0x104   :  { %723 = vmatprep.mubr.msk.f32.mxu0 %vm1023_vm13, %v1018_v20 }
 0x1d2   :  { %v1184_v55 = vpop.f32.mrb[0].mxu0 }
 0x1d3   :  { %v263_v56 = vrot.slane %v1184_v55, 1  ;;  %v274_v57 = vrot.slane %v1184_v55, 2  ;;  %v283_v58 = vrot.slane %v1184_v55, 3  ;;  %v243_v59 = vpop.f32.mrb[1].mxu0  ;;  %v292_v60 = vrot.slane %v1184_v55, 4 }
 0x1d4   :  { %v262_v62 = vrot.slane %v243_v59, 1  ;;  %v273_v63 = vrot.slane %v243_v59, 2  ;;  %v282_v0 = vrot.slane %v243_v59, 3  ;;  %v291_v2 = vrot.slane %v243_v59, 4 }
 0x1d6   :  { %v1194_v5 = vpop.f32.mrb[2].mxu0  ;;  %v298_v6 = vsel %vm295_vm6, %v291_v2, %v292_v60  ;;  %v280_v7 = vsel %vm277_vm8, %v273_v63, %v274_v57  ;;  %v271_v8 = vsel %vm268_vm9, %v262_v62, %v263_v56  ;;  %v289_v9 = vsel %vm286_vm10, %v282_v0, %v283_v58 }
 0x1d7   :  { %v253_v10 = vpop.f32.mrb[3].mxu0  ;;  %638 = vmatprep.mubr.msk.f32.mxu1 %vm348_vm7, %v298_v6  ;;  %v265_v11 = vrot.slane %v1194_v5, 1  ;;  %v276_v12 = vrot.slane %v1194_v5, 2  ;;  %v285_v13 = vrot.slane %v1194_v5, 3  ;;  %v294_v22 = vrot.slane %v1194_v5, 4  ;;  %v516_v6 = vld [vmem:[#allocation10 + $0x28] sm:$0xff] }
 0x1d8   :  { %v264_v14 = vrot.slane %v253_v10, 1  ;;  %v275_v15 = vrot.slane %v253_v10, 2  ;;  %v284_v16 = vrot.slane %v253_v10, 3  ;;  %v293_v17 = vrot.slane %v253_v10, 4 }
 0x1d9   :  { %v272_v18 = vsel %vm268_vm9, %v265_v11, %v262_v62  ;;  %v281_v19 = vsel %vm277_vm8, %v276_v12, %v273_v63  ;;  %v290_v21 = vsel %vm286_vm10, %v285_v13, %v282_v0  ;;  %v299_v35 = vsel %vm295_vm6, %v294_v22, %v291_v2  ;;  %v511_v62 = vld [vmem:[#allocation10] sm:$0xff]  ;;  %v512_v63 = vld [vmem:[#allocation10 + $0x8] sm:$0xff]  ;;  %v513_v2 = vld [vmem:[#allocation10 + $0x10] sm:$0xff] }
 0x1da   :  { %v279_v23 = vsel %vm277_vm8, %v274_v57, %v275_v15  ;;  %v270_v24 = vsel %vm268_vm9, %v263_v56, %v264_v14  ;;  %v288_v25 = vsel %vm286_vm10, %v283_v58, %v284_v16  ;;  %v269_v26 = vsel %vm268_vm9, %v264_v14, %v265_v11  ;;  %v519_v11 = vld [vmem:[#allocation10 + $0x40] sm:$0xff]  ;;  %v521_v14 = vld [vmem:[#allocation10 + $0x50] sm:$0xff] }
 0x1db   :  { %v813_v27 = vpack.i.bf16 %v279_v23, %v280_v7  ;;  %v808_v28 = vpack.i.bf16 %v270_v24, %v271_v8  ;;  %v818_v29 = vpack.i.bf16 %v288_v25, %v289_v9  ;;  %v278_v31 = vsel %vm277_vm8, %v275_v15, %v276_v12  ;;  %v517_v8 = vld [vmem:[#allocation10 + $0x30] sm:$0xff]  ;;  %v518_v9 = vld [vmem:[#allocation10 + $0x38] sm:$0xff]  ;;  %v520_v12 = vld [vmem:[#allocation10 + $0x48] sm:$0xff] }
 0x1dc   :  { %v287_v32 = vsel %vm286_vm10, %v284_v16, %v285_v13  ;;  %v297_v33 = vsel %vm295_vm6, %v292_v60, %v293_v17  ;;  %v296_v34 = vsel %vm295_vm6, %v293_v17, %v294_v22  ;;  %v769_v0 = vpack.c.bf16 %v512_v63, %v511_v62  ;;  %v522_v15 = vld [vmem:[#allocation10 + $0x58] sm:$0xff]  ;;  %v523_v17 = vld [vmem:[#allocation10 + $0x60] sm:$0xff] }
 0x1dd   :  { %814 = vrot.lane.b32.xlu1 %v813_v27, %s1020_s6  ;;  %809 = vrot.lane.b32.xlu0 %v808_v28, %s1021_s11  ;;  %v772_v4 = vpack.c.bf16 %v514_v3, %v513_v2  ;;  %v781_v13 = vpack.c.bf16 %v520_v12, %v519_v11  ;;  %v784_v16 = vpack.c.bf16 %v522_v15, %v521_v14  ;;  %v526_v22 = vld [vmem:[#allocation10 + $0x78] sm:$0xff] }
 0x1de   :  { %770 = vmatpush3.bf16.msra.mxu0 %v769_v0  ;;  %v637_v24 = vld [vmem:[#allocation8] ss:$0 sm:$0xff] }
 0x1df   :  { %771 = vmatprep.subr.bf16.mxu0 %v1019_v30 }
 0x1e1   :  { %819 = vrot.lane.b32.xlu0 %v818_v29, %s1022_s12  ;;  %308 = vrot.lane.b32.xlu1 %v269_v26, %s1021_s11 }
 0x1e2   :  { %773 = vmatpush3.bf16.msra.mxu0 %v772_v4 }
 0x1e3   :  { %774 = vmatprep.subr.bf16.mxu0 %v1019_v30 }
 0x1e5   :  { %324 = vrot.lane.b32.xlu0 %v278_v31, %s1020_s6  ;;  %340 = vrot.lane.b32.xlu1 %v287_v32, %s1022_s12 }
 0x1e9   :  { %310 = vrot.lane.b32.xlu0 %v272_v18, %s1021_s11  ;;  %326 = vrot.lane.b32.xlu1 %v281_v19, %s1020_s6  ;;  %v524_v18 = vld [vmem:[#allocation10 + $0x68] sm:$0xff] }
 0x1ea   :  { %v787_v19 = vpack.c.bf16 %v524_v18, %v523_v17 }
 0x1ed   :  { %342 = vrot.lane.b32.xlu0 %v290_v21, %s1022_s12  ;;  %v525_v21 = vld [vmem:[#allocation10 + $0x70] sm:$0xff] }
 0x1ee   :  { %v790_v23 = vpack.c.bf16 %v526_v22, %v525_v21 }
 0x24f   :  { %v815_v36 = vpop.permute.xlu1 %814  ;;  %v810_v37 = vpop.permute.xlu0 %809 }
 0x250   :  { %v811_v38 = vunpack.i.l.bf16 %v810_v37  ;;  %v816_v39 = vunpack.i.l.bf16 %v815_v36  ;;  %v812_v40 = vunpack.i.h.bf16 %v810_v37  ;;  %v817_v44 = vunpack.i.h.bf16 %v815_v36 }
 0x252   :  { %v349_v1 = vsel %vm348_vm7, %v243_v59, %v811_v38  ;;  %v350_v48 = vsel %vm348_vm7, %v1184_v55, %v812_v40 }
 0x253   :  { %v820_v41 = vpop.permute.xlu0 %819  ;;  %v309_v42 = vpop.permute.xlu1 %308  ;;  %v354_v45 = vsel %vm353_vm11, %v349_v1, %v816_v39  ;;  %v355_v51 = vsel %vm353_vm11, %v350_v48, %v817_v44 }
 0x254   :  { %v821_v43 = vunpack.i.l.bf16 %v820_v41  ;;  %v822_v46 = vunpack.i.h.bf16 %v820_v41  ;;  %v351_v52 = vsel %vm348_vm7, %v253_v10, %v309_v42  ;;  %v778_v10 = vpack.c.bf16 %v518_v9, %v517_v8 }
 0x256   :  { %v359_v47 = vsel %vm358_vm12, %v354_v45, %v821_v43  ;;  %v360_v53 = vsel %vm358_vm12, %v355_v51, %v822_v46 }
 0x257   :  { %v325_v49 = vpop.permute.xlu0 %324  ;;  %467 = vmatmul.mubr.f32.vlgmr.msra.gmra.mrb[0].mxu1 %v359_v47  ;;  %v341_v50 = vpop.permute.xlu1 %340 }
 0x258   :  { %639 = vmatprep.mubr.msk.f32.mxu1 %vm348_vm7, %v297_v33  ;;  %v356_v54 = vsel %vm353_vm11, %v351_v52, %v325_v49  ;;  %v491_v33 = vld [vmem:[#allocation13] sm:$0xff] }
 0x259   :  { %v361_v58 = vsel %vm358_vm12, %v356_v54, %v341_v50 }
 0x25b   :  { %v311_v56 = vpop.permute.xlu0 %310  ;;  %472 = vmatmul.mubr.f32.gmra.mrb[2].mxu1 %v360_v53  ;;  %v327_v57 = vpop.permute.xlu1 %326 }
 0x25c   :  { %640 = vmatprep.mubr.msk.f32.mxu1 %vm348_vm7, %v296_v34  ;;  %v352_v55 = vsel %vm348_vm7, %v1194_v5, %v311_v56  ;;  %v515_v5 = vld [vmem:[#allocation10 + $0x20] sm:$0xff]  ;;  %v492_v34 = vld [vmem:[#allocation13 + $0x8] sm:$0xff] }
 0x25d   :  { %v357_v60 = vsel %vm353_vm11, %v352_v55, %v327_v57  ;;  %v775_v7 = vpack.c.bf16 %v516_v6, %v515_v5 }
 0x25f   :  { %v343_v59 = vpop.permute.xlu0 %342  ;;  %477 = vmatmul.mubr.f32.gmra.mrb[4].mxu1 %v361_v58  ;;  %776 = vmatpush3.bf16.msra.mxu0 %v775_v7 }
 0x260   :  { %641 = vmatprep.mubr.msk.f32.mxu1 %vm348_vm7, %v299_v35  ;;  %v362_v61 = vsel %vm358_vm12, %v357_v60, %v343_v59  ;;  %777 = vmatprep.subr.bf16.mxu0 %v1019_v30  ;;  %v642_v60 = vld [vmem:[#allocation11] ss:$0 sm:$0xff] }
 0x263   :  { %482 = vmatmul.mubr.f32.gmra.mrb[6].mxu1 %v362_v61  ;;  %779 = vmatpush3.bf16.msra.mxu0 %v778_v10 }
 0x264   :  { %780 = vmatprep.subr.bf16.mxu0 %v1019_v30 }
 0x267   :  { %782 = vmatpush3.bf16.msra.mxu0 %v781_v13 }
 0x268   :  { %783 = vmatprep.subr.bf16.mxu0 %v1019_v30 }
 0x26b   :  { %785 = vmatpush3.bf16.msra.mxu0 %v784_v16 }
 0x26c   :  { %786 = vmatprep.subr.bf16.mxu0 %v1019_v30 }
 0x26f   :  { %788 = vmatpush3.bf16.msra.mxu0 %v787_v19 }
 0x270   :  { %789 = vmatprep.subr.bf16.mxu0 %v1019_v30 }
 0x273   :  { %791 = vmatpush3.bf16.msra.mxu0 %v790_v23 }
 0x32a   :  { %v468_v25 = vpop.f32.mrb[0].mxu1 }
 0x32b   :  { %v469_v26 = vadd.f32 %v637_v24, %v468_v25  ;;  %v470_v27 = vpop.f32.mrb[1].mxu1 }
 0x32d   :  { %v487_v29 = vmax.f32 %v469_v26, 0.0 }
 0x32e   :  { %v473_v28 = vpop.f32.mrb[2].mxu1 }
 0x32f   :  { %v474_v31 = vadd.f32 %v637_v24, %v473_v28  ;;  %v475_v32 = vpop.f32.mrb[3].mxu1  ;;  %v493_v37 = vmul.f32 %v491_v33, %v487_v29 }
 0x331   :  { %v488_v35 = vmax.f32 %v474_v31, 0.0 }
 0x332   :  { %v478_v36 = vpop.f32.mrb[4].mxu1 }
 0x333   :  { %v494_v38 = vmul.f32 %v492_v34, %v488_v35  ;;  %v479_v39 = vadd.f32 %v637_v24, %v478_v36  ;;  %v480_v40 = vpop.f32.mrb[5].mxu1 }
 0x335   :  { %v497_v20 = vmax.f32 %v493_v37, %v494_v38  ;;  %v489_v41 = vmax.f32 %v479_v39, 0.0 }
 0x336   :  { %v483_v1 = vpop.f32.mrb[6].mxu1 }
 0x337   :  { %v498_v30 = vrot.slane %v497_v20, 4  ;;  %v484_v42 = vadd.f32 %v637_v24, %v483_v1  ;;  %v485_v43 = vpop.f32.mrb[7].mxu1  ;;  %v495_v46 = vmul.f32 %v491_v33, %v489_v41 }
 0x339   :  { %v499_v44 = vmax.f32 %v497_v20, %v498_v30  ;;  %v490_v45 = vmax.f32 %v484_v42, 0.0 }
 0x33b   :  { %v496_v47 = vmul.f32 %v492_v34, %v490_v45  ;;  %v500_v48 = vrot.slane %v499_v44, 2 }
 0x33d   :  { %v504_v49 = vmax.f32 %v495_v46, %v496_v47  ;;  %v501_v51 = vmax.f32 %v499_v44, %v500_v48 }
 0x33f   :  { %v505_v50 = vrot.slane %v504_v49, 4  ;;  %v502_v54 = vrot.slane %v501_v51, 1 }
 0x341   :  { %v506_v52 = vmax.f32 %v504_v49, %v505_v50  ;;  %v503_v57 = vmax.f32 %v501_v51, %v502_v54 }
 0x343   :  { %v507_v53 = vrot.slane %v506_v52, 2 }
 0x345   :  { %v508_v56 = vmax.f32 %v506_v52, %v507_v53 }
 0x347   :  { %v509_v55 = vrot.slane %v508_v56, 1 }
 0x349   :  { %v510_v58 = vmax.f32 %v508_v56, %v509_v55 }
 0x34b   :  { %v537_v59 = vsel %vm536_vm14, %v510_v58, %v503_v57 }
 0x34c   :  { %724 = vmatmul.mubr.f32.vlgmr.msra.gmra.mrb[4].mxu0 %v537_v59 }
 0x41f   :  { %v605_v61 = vpop.f32.mrb[4].mxu0 }
 0x420   :  { %v606_v62 = vadd.f32 %v642_v60, %v605_v61  ;;  %v725_v63 = vpop.f32.mrb[5].mxu0 }
 0x422   :  { %609 = vst [vmem:[#allocation14] sm:$0x3] %v606_v62 }
 0x423   :  { %988 = shalt.err (!%p985_p4)
}
 0x424   :  { %s989_s20 = scalar_lea.hbm %s1277_s7, 32 }
 0x425   :  { %p990_p5 = scmp.ne.s32.totalorder %s1277_s7, %s989_s20  ;;  %p993_p6 = scmp.lt.u32.totalorder %s989_s20, %s1277_s7 }
 0x427   :  { %p995_p7 = pnand %p993_p6, %p990_p5 }
 0x429   :  { %998 = shalt.err (!%p995_p7)
}
 0x42a   :  { %619 = dma.vmem_to_hbm [thread:$0]  %s617_s0, 32, %s1277_s7, [#allocation4]  }
 0x42b   :  { %1007 = dma.done.wait [#allocation4], 32  }
 0x42c   :  { %1008 = vsyncadd [#allocation4], 4294967264 }
 0x42d   :  { %623 = vsyncpa [#allocation3], 1 }
 0x42e   :  { %624 = vsyncpa [#allocation6], 1 }
 0x42f   :  { %625 = vsyncpa [#allocation9], 1 }
 0x430   :  { %626 = vsyncpa [#allocation12], 1 }
 0x431   :  { %627 = vsyncpa [#allocation4], 1 }

</bundles_post_ra>
